<compile_context>
chip_gen: v5e
topology: v5e:2x2
jax: 0.10.0
libtpu: 0.0.40
codegen_flags: <defaults>
</compile_context>

<pallas_src>
import functools

import jax
import jax.numpy as jnp
from jax.experimental import pallas as pl
from jax.experimental.pallas import tpu as pltpu  # noqa: F401  (TPU backend)


# -----------------------------------------------------------------------------
# Instance-feature kernel: fused GAP-stub linear (3 -> 512) + fc (512 -> C)
# -----------------------------------------------------------------------------
def _instance_feature_kernel(p_ref, sw_ref, sb_ref, fw_ref, fb_ref, o_ref):
    h = jnp.dot(p_ref[...], sw_ref[...], preferred_element_type=jnp.float32) + sb_ref[...]
    o_ref[...] = jnp.dot(h, fw_ref[...], preferred_element_type=jnp.float32) + fb_ref[...]


def instance_features(pooled, params):
    M = pooled.shape[0]
    C = params["fc_w"].shape[1]
    return pl.pallas_call(
        _instance_feature_kernel,
        out_shape=jax.ShapeDtypeStruct((M, C), jnp.float32),
    )(pooled, params["stub_w"], params["stub_b"], params["fc_w"], params["fc_b"])


# -----------------------------------------------------------------------------
# Fully fused transformer kernel: all blocks + final norm + 3 heads, one call
# -----------------------------------------------------------------------------
def _transformer_kernel(
    x_ref,
    ln1_g_ref, ln1_b_ref, qkv_w_ref, proj_w_ref, proj_b_ref,
    ln2_g_ref, ln2_b_ref, fc1_w_ref, fc1_b_ref, fc2_w_ref, fc2_b_ref,
    norm_g_ref, norm_b_ref, head_w_ref, head_b_ref,
    attnw_ref, bagfeat_ref, x1_ref, x2_ref, x3_ref,
    *, depth, num_heads, scale,
):
    B, N, C = x_ref.shape
    hd = C // num_heads

    def layer_norm(v, g, b):
        mu = jnp.mean(v, axis=-1, keepdims=True)
        var = jnp.mean((v - mu) ** 2, axis=-1, keepdims=True)
        return (v - mu) * jax.lax.rsqrt(var + 1e-5) * g + b

    # cls-token mask, generated in-kernel (multiplicative on logits, as in the
    # reference Attention.gen_mask): zero among the first 3 cls tokens (i != j).
    row = jax.lax.broadcasted_iota(jnp.int32, (N, N), 0)
    col = jax.lax.broadcasted_iota(jnp.int32, (N, N), 1)
    mask = jnp.where((row < 3) & (col < 3) & (row != col), 0.0, 1.0).astype(jnp.float32)

    for b in range(B):                      # static unroll (B tiny)
        xb = x_ref[b]                       # [N, C]
        for layer in range(depth):          # static unroll (depth tiny)
            # TODO(synk): for large depth switch to lax.fori_loop with dynamic
            # ref[layer] indexing to bound code size / live ranges.
            is_last = layer == depth - 1

            # --- attention branch ---
            xn = layer_norm(xb, ln1_g_ref[layer], ln1_b_ref[layer])
            qkv = jnp.dot(xn, qkv_w_ref[layer],
                          preferred_element_type=jnp.float32)        # [N, 3C]
            proj_w_l = proj_w_ref[layer]                              # [C, C]

            attn_out = jnp.zeros((N, C), jnp.float32)
            w_sum = jnp.zeros((N, N), jnp.float32)
            for h in range(num_heads):                                # static unroll
                lo, hi = h * hd, (h + 1) * hd
                qh = qkv[:, lo:hi]
                kh = qkv[:, C + lo:C + hi]
                vh = qkv[:, 2 * C + lo:2 * C + hi]
                # q @ k^T without materializing a transpose (contract last dims)
                s = jax.lax.dot_general(
                    qh, kh, (((1,), (1,)), ((), ())),
                    preferred_element_type=jnp.float32) * scale
                s = s * mask                       # multiplicative mask (as in ref)
                s = s - jnp.max(s, axis=-1, keepdims=True)
                p = jnp.exp(s)
                p = p * pl.reciprocal(jnp.sum(p, axis=-1, keepdims=True),
                                      approx=True)
                if is_last:
                    w_sum = w_sum + p
                ho = jnp.dot(p, vh, preferred_element_type=jnp.float32)   # [N, hd]
                # fold head output straight into the projection (no concat)
                attn_out = attn_out + jnp.dot(ho, proj_w_l[lo:hi, :],
                                              preferred_element_type=jnp.float32)
            attn_out = attn_out + proj_b_ref[layer]
            xb = xb + attn_out                 # residual (drop_path identity)

            # --- MLP branch ---
            xn2 = layer_norm(xb, ln2_g_ref[layer], ln2_b_ref[layer])
            h1 = jnp.dot(xn2, fc1_w_ref[layer],
                         preferred_element_type=jnp.float32) + fc1_b_ref[layer]
            h1 = jax.nn.gelu(h1, approximate=False)     # nn.GELU default (erf)
            h2 = jnp.dot(h1, fc2_w_ref[layer],
                         preferred_element_type=jnp.float32) + fc2_b_ref[layer]
            xb = xb + h2

            if is_last:
                # reference: attn_weights = weights.sum(dim=1) / 8  (literal 8)
                attnw_ref[b] = w_sum * 0.125

        # --- final LayerNorm + cls heads (fused in the same kernel) ---
        xno = layer_norm(xb, norm_g_ref[...], norm_b_ref[...])       # [N, C]
        bagfeat_ref[b] = xno[:3, :]
        x1_ref[b:b + 1, :] = (jnp.dot(xno[0:1, :], head_w_ref[0],
                                      preferred_element_type=jnp.float32)
                              + head_b_ref[0])
        x2_ref[b:b + 1, :] = (jnp.dot(xno[1:2, :], head_w_ref[1],
                                      preferred_element_type=jnp.float32)
                              + head_b_ref[1])
        x3_ref[b:b + 1, :] = (jnp.dot(xno[2:3, :], head_w_ref[2],
                                      preferred_element_type=jnp.float32)
                              + head_b_ref[2])


def transformer_forward(x, params, *, num_heads):
    B, N, C = x.shape
    blocks = params["blocks"]
    depth = blocks["qkv_w"].shape[0]
    ncls = params["head_w"].shape[-1]
    hd = C // num_heads
    kernel = functools.partial(_transformer_kernel, depth=depth,
                               num_heads=num_heads, scale=hd ** -0.5)
    out_shape = [
        jax.ShapeDtypeStruct((B, N, N), jnp.float32),   # last-block attn weights (head-reduced)
        jax.ShapeDtypeStruct((B, 3, C), jnp.float32),   # bag_feat (normed cls tokens)
        jax.ShapeDtypeStruct((B, ncls), jnp.float32),   # y_0vs123
        jax.ShapeDtypeStruct((B, ncls), jnp.float32),   # y_01vs23
        jax.ShapeDtypeStruct((B, ncls), jnp.float32),   # y_012vs3
    ]
    return pl.pallas_call(
        kernel,
        out_shape=out_shape,
    )(
        x,
        blocks["ln1_g"], blocks["ln1_b"], blocks["qkv_w"],
        blocks["proj_w"], blocks["proj_b"],
        blocks["ln2_g"], blocks["ln2_b"],
        blocks["fc1_w"], blocks["fc1_b"], blocks["fc2_w"], blocks["fc2_b"],
        params["norm_g"], params["norm_b"],
        params["head_w"], params["head_b"],
    )


# -----------------------------------------------------------------------------
# Parameter init (deterministic, synthetic -- no checkpoint loading).
# Per-layer weights are stacked along a leading depth axis for in-kernel reuse.
# -----------------------------------------------------------------------------
def init_params(key, embed_dim, depth, num_heads, mlp_ratio, num_classes):
    C = embed_dim
    H = int(C * mlp_ratio)

    def w(k, shape, std=0.02):
        return std * jax.random.normal(k, shape, jnp.float32)

    keys = iter(jax.random.split(key, 8 + 4 * depth))
    params = {
        # TODO(synk): pretrained torchvision resnet18 backbone cannot be loaded;
        # replaced by a deterministic global-avg-pool + linear stub that still
        # produces 512-d instance features so downstream shapes match.
        "stub_w": w(next(keys), (3, 512)),
        "stub_b": jnp.zeros((1, 512), jnp.float32),
        "fc_w": w(next(keys), (512, C)),
        "fc_b": jnp.zeros((1, C), jnp.float32),
        "cls_token": jax.random.normal(next(keys), (1, 3, C), jnp.float32),
        "norm_g": jnp.ones((1, C), jnp.float32),
        "norm_b": jnp.zeros((1, C), jnp.float32),
        "head_w": w(next(keys), (3, C, num_classes)),       # head1/2/3 stacked
        "head_b": jnp.zeros((3, 1, num_classes), jnp.float32),
    }
    params["blocks"] = {
        "ln1_g": jnp.ones((depth, 1, C), jnp.float32),
        "ln1_b": jnp.zeros((depth, 1, C), jnp.float32),
        "qkv_w": jnp.stack([w(next(keys), (C, 3 * C)) for _ in range(depth)]),  # qkv_bias=False
        "proj_w": jnp.stack([w(next(keys), (C, C)) for _ in range(depth)]),
        "proj_b": jnp.zeros((depth, 1, C), jnp.float32),
        "ln2_g": jnp.ones((depth, 1, C), jnp.float32),
        "ln2_b": jnp.zeros((depth, 1, C), jnp.float32),
        "fc1_w": jnp.stack([w(next(keys), (C, H)) for _ in range(depth)]),
        "fc1_b": jnp.zeros((depth, 1, H), jnp.float32),
        "fc2_w": jnp.stack([w(next(keys), (H, C)) for _ in range(depth)]),
        "fc2_b": jnp.zeros((depth, 1, C), jnp.float32),
    }
    return params


# -----------------------------------------------------------------------------
# Full forward (layout glue in plain JAX, all compute in two Pallas kernels)
# -----------------------------------------------------------------------------
def forward(params, x_imgs, len_list, *, num_heads):
    # Feature extractor stub: global avg pool over HxW, then fused 3->512->C.
    pooled = jnp.mean(x_imgs, axis=(2, 3))                    # [M, 3]
    ins_feat = instance_features(pooled, params)              # [M, C]

    # Split into bags (len_list) and pad_sequence with 0 (batch_first).
    max_len = max(len_list)
    ins_feats, bags, idx = [], [], 0
    for L in len_list:
        f = ins_feat[idx:idx + L]
        ins_feats.append(f)
        bags.append(jnp.pad(f, ((0, max_len - L), (0, 0))))
        idx += L
    x = jnp.stack(bags, axis=0)                               # [B, max_len, C]
    B, C = x.shape[0], x.shape[-1]
    cls = jnp.broadcast_to(params["cls_token"], (B, 3, C))
    x = jnp.concatenate([cls, x], axis=1)                     # [B, N, C]

    attnw, bag_feat, x1, x2, x3 = transformer_forward(x, params, num_heads=num_heads)

    return {
        "y_0vs123": x1,
        "y_01vs23": x2,
        "y_012vs3": x3,
        "atten_weight": attnw,
        "bag_feat": bag_feat,
        "ins_feats": ins_feats,
        "cls_token_feat": params["cls_token"],
    }


if __name__ == "__main__":
    embed_dim = 32
    depth = 2
    num_heads = 4
    mlp_ratio = 4.0
    num_classes = 10

    len_list = [4, 2]                 # two bags, 6 instance images total
    M = sum(len_list)

    root = jax.random.PRNGKey(0)
    k_img, k_par = jax.random.split(root)
    x_imgs = jax.random.normal(k_img, (M, 3, 16, 16), jnp.float32)   # NCHW

    params = init_params(k_par, embed_dim, depth, num_heads, mlp_ratio, num_classes)

    out = forward(params, x_imgs, len_list, num_heads=num_heads)
    jax.tree_util.tree_map(jax.block_until_ready, out)

    # light sanity checks on shapes
    B = len(len_list)
    N = max(len_list) + 3
    assert out["y_0vs123"].shape == (B, num_classes)
    assert out["y_01vs23"].shape == (B, num_classes)
    assert out["y_012vs3"].shape == (B, num_classes)
    assert out["bag_feat"].shape == (B, 3, embed_dim)
    assert out["atten_weight"].shape == (B, N, N)

    print("KERNEL_OK")
</pallas_src>

<mosaic_0001>
module attributes {stable_mosaic.version = 11 : i64} {
  func.func @_instance_feature_kernel(%arg0: memref<6x3xf32, #tpu.memory_space<vmem>>, %arg1: memref<3x512xf32, #tpu.memory_space<vmem>>, %arg2: memref<1x512xf32, #tpu.memory_space<vmem>>, %arg3: memref<512x32xf32, #tpu.memory_space<vmem>>, %arg4: memref<1x32xf32, #tpu.memory_space<vmem>>, %arg5: memref<6x32xf32, #tpu.memory_space<vmem>>) attributes {dimension_semantics = [], scalar_prefetch = 0 : i64, scratch_operands = 0 : i64, tpu.core_type = #tpu.core_type<tc>} {
    %c0 = arith.constant 0 : index
    %c0_0 = arith.constant 0 : index
    %0 = vector.load %arg0[%c0, %c0_0] : memref<6x3xf32, #tpu.memory_space<vmem>>, vector<6x3xf32>
    %c0_1 = arith.constant 0 : index
    %c0_2 = arith.constant 0 : index
    %1 = vector.load %arg1[%c0_1, %c0_2] : memref<3x512xf32, #tpu.memory_space<vmem>>, vector<3x512xf32>
    %cst = arith.constant dense<0.000000e+00> : vector<6x512xf32>
    %2 = tpu.matmul %0, %1, %cst {dimension_numbers = #tpu.dot_dimension_numbers<[1], [0], [0], [1], [0, 0, 1, 1], [], []>} : vector<6x3xf32>, vector<3x512xf32>, vector<6x512xf32> -> vector<6x512xf32>
    %c0_3 = arith.constant 0 : index
    %c0_4 = arith.constant 0 : index
    %3 = vector.load %arg2[%c0_3, %c0_4] : memref<1x512xf32, #tpu.memory_space<vmem>>, vector<1x512xf32>
    %4 = vector.broadcast %3 : vector<1x512xf32> to vector<6x512xf32>
    %5 = arith.addf %2, %4 : vector<6x512xf32>
    %c0_5 = arith.constant 0 : index
    %c0_6 = arith.constant 0 : index
    %6 = vector.load %arg3[%c0_5, %c0_6] : memref<512x32xf32, #tpu.memory_space<vmem>>, vector<512x32xf32>
    %cst_7 = arith.constant dense<0.000000e+00> : vector<6x32xf32>
    %7 = tpu.matmul %5, %6, %cst_7 {dimension_numbers = #tpu.dot_dimension_numbers<[1], [0], [0], [1], [0, 0, 1, 1], [], []>} : vector<6x512xf32>, vector<512x32xf32>, vector<6x32xf32> -> vector<6x32xf32>
    %c0_8 = arith.constant 0 : index
    %c0_9 = arith.constant 0 : index
    %8 = vector.load %arg4[%c0_8, %c0_9] : memref<1x32xf32, #tpu.memory_space<vmem>>, vector<1x32xf32>
    %9 = vector.broadcast %8 : vector<1x32xf32> to vector<6x32xf32>
    %10 = arith.addf %7, %9 : vector<6x32xf32>
    %c0_10 = arith.constant 0 : index
    %c0_11 = arith.constant 0 : index
    %11 = vector.load %arg5[%c0_10, %c0_11] : memref<6x32xf32, #tpu.memory_space<vmem>>, vector<6x32xf32>
    tpu.vector_store %arg5[%c0_10, %c0_11], %10 {strides = array<i32>} : memref<6x32xf32, #tpu.memory_space<vmem>>, vector<6x32xf32>,
    return
  }
}

</mosaic_0001>

<bundles_post_ra>
// kernel: tpu_custom_call.1
= control target key start
LH: loop header
LB: loop body
LE: loop exit
PB: predicated region body
PF: predicated region fallthrough
CT: control target
= control target key end

     0   :  { %vm47_vm0 = vcmask 1042432   ;;  %vm43_vm1 = vcmask 23552   ;;  %s583_s0 = inlined_call_operand.vmem [shape: f32[6,3], index: 0, kind: input, shape index: {}]   ;;  %s584_s1 = inlined_call_operand.vmem [shape: f32[3,512], index: 1, kind: input, shape index: {}]   ;;  %s585_s2 = inlined_call_operand.vmem [shape: f32[1,512], index: 2, kind: input, shape index: {}]   ;;  %s586_s3 = inlined_call_operand.vmem [shape: f32[512,32], index: 3, kind: input, shape index: {}]   ;;  %s587_s4 = inlined_call_operand.vmem [shape: f32[1,32], index: 4, kind: input, shape index: {}]   ;;  %s588_s5 = inlined_call_operand.hbm [shape: f32[6,32], index: 5, kind: output, shape index: {}]  }
   0x1   :  { %v23_v0 = vld [vmem:[%s584_s1 + $0x8] sm:$0x77]  ;;  %v22_v1 = vld [vmem:[%s584_s1] sm:$0x77]  ;;  %v183_v7 = vld [vmem:[%s586_s3 + $0x178] sm:$0xff] }
   0x2   :  { %38 = vst [vmem:[#allocation1 + $0x10] ss:$2 sm:$0xff] %v23_v0  ;;  %v21_v2 = vld [vmem:[%s583_s0] sm:$0x3f]  ;;  %v151_v8 = vld [vmem:[%s586_s3 + $0x78] sm:$0xff]  ;;  %v182_v11 = vld [vmem:[%s586_s3 + $0x170] sm:$0xff] }
   0x3   :  { %36 = vst [vmem:[#allocation1] ss:$2 sm:$0xff] %v22_v1  ;;  %v199_v9 = vld [vmem:[%s586_s3 + $0x1f8] sm:$0xff]  ;;  %v150_v12 = vld [vmem:[%s586_s3 + $0x70] sm:$0xff]  ;;  %v181_v15 = vld [vmem:[%s586_s3 + $0x168] sm:$0xff] }
   0x4   :  { %v167_v10 = vld [vmem:[%s586_s3 + $0xf8] sm:$0xff]  ;;  %v198_v13 = vld [vmem:[%s586_s3 + $0x1f0] sm:$0xff]  ;;  %v149_v16 = vld [vmem:[%s586_s3 + $0x68] sm:$0xff] }
   0x5   :  { %v166_v14 = vld [vmem:[%s586_s3 + $0xf0] sm:$0xff]  ;;  %v197_v17 = vld [vmem:[%s586_s3 + $0x1e8] sm:$0xff]  ;;  %v180_v19 = vld [vmem:[%s586_s3 + $0x160] sm:$0xff] }
   0x6   :  { %v165_v18 = vld [vmem:[%s586_s3 + $0xe8] sm:$0xff]  ;;  %v148_v20 = vld [vmem:[%s586_s3 + $0x60] sm:$0xff]  ;;  %v179_v23 = vld [vmem:[%s586_s3 + $0x158] sm:$0xff] }
   0x7   :  { %v196_v21 = vld [vmem:[%s586_s3 + $0x1e0] sm:$0xff]  ;;  %v147_v24 = vld [vmem:[%s586_s3 + $0x58] sm:$0xff]  ;;  %v178_v27 = vld [vmem:[%s586_s3 + $0x150] sm:$0xff] }
   0x8   :  { %v164_v22 = vld [vmem:[%s586_s3 + $0xe0] sm:$0xff]  ;;  %v195_v25 = vld [vmem:[%s586_s3 + $0x1d8] sm:$0xff]  ;;  %v146_v28 = vld [vmem:[%s586_s3 + $0x50] sm:$0xff] }
   0x9   :  { %v41_v3 = vld.sshfl [vmem:[#allocation1 + $0x10] sm:$0xff pattern:$0x75316420]  ;;  %v42_v4 = vld.sshfl [vmem:[#allocation1 + $0x18] sm:$0xff pattern:$0x75316420] }
   0xa   :  { %306 = vmatpush.msk.msra.mxu2 %vm47_vm0, %v41_v3  ;;  %308 = vmatpush.msk.msra.mxu3 %vm47_vm0, %v42_v4  ;;  %v39_v5 = vld.sshfl [vmem:[#allocation1] sm:$0xff pattern:$0x75316420]  ;;  %v40_v6 = vld.sshfl [vmem:[#allocation1 + $0x8] sm:$0xff pattern:$0x75316420] }
   0xb   :  { %307 = vmatmul.msk.f32.vlgmr.msra.gmra.mxu2 %vm43_vm1, %v21_v2  ;;  %309 = vmatmul.msk.f32.vlgmr.msra.gmra.mxu3 %vm43_vm1, %v21_v2  ;;  %v163_v26 = vld [vmem:[%s586_s3 + $0xd8] sm:$0xff]  ;;  %v194_v29 = vld [vmem:[%s586_s3 + $0x1d0] sm:$0xff] }
   0xc   :  { %302 = vmatpush.msk.msra.mxu0 %vm47_vm0, %v39_v5  ;;  %304 = vmatpush.msk.msra.mxu1 %vm47_vm0, %v40_v6  ;;  %v162_v30 = vld [vmem:[%s586_s3 + $0xd0] sm:$0xff] }
   0xd   :  { %303 = vmatmul.msk.f32.vlgmr.msra.gmra.mxu0 %vm43_vm1, %v21_v2  ;;  %305 = vmatmul.msk.f32.vlgmr.msra.gmra.mxu1 %vm43_vm1, %v21_v2 }
   0xe   :  { %244 = vmatpush.msrb.mxu2 %v183_v7  ;;  %204 = vmatpush.msrb.mxu0 %v151_v8 }
   0xf   :  { %264 = vmatpush.msrb.mxu3 %v199_v9  ;;  %224 = vmatpush.msrb.mxu1 %v167_v10 }
  0x10   :  { %245 = vmatpush.msrb.mxu2 %v182_v11  ;;  %205 = vmatpush.msrb.mxu0 %v150_v12 }
  0x11   :  { %265 = vmatpush.msrb.mxu3 %v198_v13  ;;  %225 = vmatpush.msrb.mxu1 %v166_v14 }
  0x12   :  { %246 = vmatpush.msrb.mxu2 %v181_v15  ;;  %206 = vmatpush.msrb.mxu0 %v149_v16 }
  0x13   :  { %266 = vmatpush.msrb.mxu3 %v197_v17  ;;  %226 = vmatpush.msrb.mxu1 %v165_v18 }
  0x14   :  { %247 = vmatpush.msrb.mxu2 %v180_v19  ;;  %207 = vmatpush.msrb.mxu0 %v148_v20 }
  0x15   :  { %267 = vmatpush.msrb.mxu3 %v196_v21  ;;  %227 = vmatpush.msrb.mxu1 %v164_v22 }
  0x16   :  { %248 = vmatpush.msrb.mxu2 %v179_v23  ;;  %208 = vmatpush.msrb.mxu0 %v147_v24 }
  0x17   :  { %10 = vsyncpa [#allocation3], 0  ;;  %268 = vmatpush.msrb.mxu3 %v195_v25  ;;  %228 = vmatpush.msrb.mxu1 %v163_v26  ;;  %v177_v31 = vld [vmem:[%s586_s3 + $0x148] sm:$0xff]  ;;  %v176_v35 = vld [vmem:[%s586_s3 + $0x140] sm:$0xff]  ;;  %s293_s23 = sshll.u32 %s588_s5, 4  ;;  %vm284_vm2 = vcmask 259072   ;;  %s294_s23 = int_to_ptr.hbm [resolvable:$true] %s293_s23 }
  0x18   :  { %v145_v32 = vld [vmem:[%s586_s3 + $0x48] sm:$0xff]  ;;  %249 = vmatpush.msrb.mxu2 %v178_v27  ;;  %209 = vmatpush.msrb.mxu0 %v146_v28  ;;  %v144_v36 = vld [vmem:[%s586_s3 + $0x40] sm:$0xff]  ;;  %v175_v39 = vld [vmem:[%s586_s3 + $0x138] sm:$0xff] }
  0x19   :  { %v193_v33 = vld [vmem:[%s586_s3 + $0x1c8] sm:$0xff]  ;;  %269 = vmatpush.msrb.mxu3 %v194_v29  ;;  %229 = vmatpush.msrb.mxu1 %v162_v30  ;;  %v192_v37 = vld [vmem:[%s586_s3 + $0x1c0] sm:$0xff]  ;;  %v143_v40 = vld [vmem:[%s586_s3 + $0x38] sm:$0xff] }
  0x1a   :  { %v161_v34 = vld [vmem:[%s586_s3 + $0xc8] sm:$0xff]  ;;  %250 = vmatpush.msrb.mxu2 %v177_v31  ;;  %210 = vmatpush.msrb.mxu0 %v145_v32  ;;  %v160_v38 = vld [vmem:[%s586_s3 + $0xc0] sm:$0xff]  ;;  %v191_v41 = vld [vmem:[%s586_s3 + $0x1b8] sm:$0xff] }
  0x1b   :  { %270 = vmatpush.msrb.mxu3 %v193_v33  ;;  %230 = vmatpush.msrb.mxu1 %v161_v34  ;;  %v159_v42 = vld [vmem:[%s586_s3 + $0xb8] sm:$0xff]  ;;  %v174_v43 = vld [vmem:[%s586_s3 + $0x130] sm:$0xff]  ;;  %v173_v47 = vld [vmem:[%s586_s3 + $0x128] sm:$0xff] }
  0x1c   :  { %251 = vmatpush.msrb.mxu2 %v176_v35  ;;  %211 = vmatpush.msrb.mxu0 %v144_v36  ;;  %v142_v44 = vld [vmem:[%s586_s3 + $0x30] sm:$0xff]  ;;  %v141_v48 = vld [vmem:[%s586_s3 + $0x28] sm:$0xff]  ;;  %v172_v51 = vld [vmem:[%s586_s3 + $0x120] sm:$0xff] }
  0x1d   :  { %271 = vmatpush.msrb.mxu3 %v192_v37  ;;  %231 = vmatpush.msrb.mxu1 %v160_v38  ;;  %v190_v45 = vld [vmem:[%s586_s3 + $0x1b0] sm:$0xff]  ;;  %v189_v49 = vld [vmem:[%s586_s3 + $0x1a8] sm:$0xff]  ;;  %v140_v52 = vld [vmem:[%s586_s3 + $0x20] sm:$0xff] }
  0x1e   :  { %252 = vmatpush.msrb.mxu2 %v175_v39  ;;  %212 = vmatpush.msrb.mxu0 %v143_v40  ;;  %v158_v46 = vld [vmem:[%s586_s3 + $0xb0] sm:$0xff]  ;;  %v157_v50 = vld [vmem:[%s586_s3 + $0xa8] sm:$0xff]  ;;  %v188_v53 = vld [vmem:[%s586_s3 + $0x1a0] sm:$0xff] }
  0x1f   :  { %272 = vmatpush.msrb.mxu3 %v191_v41  ;;  %232 = vmatpush.msrb.mxu1 %v159_v42  ;;  %v156_v54 = vld [vmem:[%s586_s3 + $0xa0] sm:$0xff]  ;;  %v171_v55 = vld [vmem:[%s586_s3 + $0x118] sm:$0xff]  ;;  %v170_v58 = vld [vmem:[%s586_s3 + $0x110] sm:$0xff] }
  0x20   :  { %253 = vmatpush.msrb.mxu2 %v174_v43  ;;  %213 = vmatpush.msrb.mxu0 %v142_v44  ;;  %v139_v56 = vld [vmem:[%s586_s3 + $0x18] sm:$0xff]  ;;  %v138_v59 = vld [vmem:[%s586_s3 + $0x10] sm:$0xff]  ;;  %v169_v61 = vld [vmem:[%s586_s3 + $0x108] sm:$0xff] }
  0x21   :  { %273 = vmatpush.msrb.mxu3 %v190_v45  ;;  %233 = vmatpush.msrb.mxu1 %v158_v46  ;;  %v187_v57 = vld [vmem:[%s586_s3 + $0x198] sm:$0xff]  ;;  %v186_v62 = vld [vmem:[%s586_s3 + $0x190] sm:$0xff]  ;;  %v137_v63 = vld [vmem:[%s586_s3 + $0x8] sm:$0xff] }
  0x22   :  { %254 = vmatpush.msrb.mxu2 %v173_v47  ;;  %214 = vmatpush.msrb.mxu0 %v141_v48  ;;  %v155_v60 = vld [vmem:[%s586_s3 + $0x98] sm:$0xff]  ;;  %v154_v0 = vld [vmem:[%s586_s3 + $0x90] sm:$0xff]  ;;  %v168_v1 = vld [vmem:[%s586_s3 + $0x100] sm:$0xff] }
  0x23   :  { %274 = vmatpush.msrb.mxu3 %v189_v49  ;;  %234 = vmatpush.msrb.mxu1 %v157_v50  ;;  %v185_v2 = vld [vmem:[%s586_s3 + $0x188] sm:$0xff]  ;;  %v136_v3 = vld [vmem:[%s586_s3] sm:$0xff] }
  0x24   :  { %255 = vmatpush.msrb.mxu2 %v172_v51  ;;  %215 = vmatpush.msrb.mxu0 %v140_v52  ;;  %v153_v4 = vld [vmem:[%s586_s3 + $0x88] sm:$0xff]  ;;  %v184_v5 = vld [vmem:[%s586_s3 + $0x180] sm:$0xff] }
  0x25   :  { %275 = vmatpush.msrb.mxu3 %v188_v53  ;;  %235 = vmatpush.msrb.mxu1 %v156_v54  ;;  %v152_v6 = vld [vmem:[%s586_s3 + $0x80] sm:$0xff] }
  0x26   :  { %256 = vmatpush.msrb.mxu2 %v171_v55  ;;  %216 = vmatpush.msrb.mxu0 %v139_v56  ;;  %v24_v7 = vld [vmem:[%s585_s2] sm:$0xf]  ;;  %s338_s2 = smov [#allocation2]  }
  0x27   :  { %276 = vmatpush.msrb.mxu3 %v187_v57  ;;  %236 = vmatpush.msrb.mxu1 %v155_v60  ;;  %v26_v8 = vperm.slane %v24_v7, 0  ;;  %v27_v9 = vperm.slane %v24_v7, 1  ;;  %v28_v12 = vperm.slane %v24_v7, 2  ;;  %v29_v14 = vperm.slane %v24_v7, 3  ;;  %v311_v20 = vld [vmem:[%s587_s4] ss:$0 sm:$0xff] }
  0x28   :  { %257 = vmatpush.msrb.mxu2 %v170_v58  ;;  %217 = vmatpush.msrb.mxu0 %v138_v59  ;;  %s291_s20 = sshll.u32 %s338_s2, 4  ;;  %s292_s20 = int_to_ptr.vmem [resolvable:$true] %s291_s20 }
  0x29   :  { %277 = vmatpush.msrb.mxu3 %v186_v62  ;;  %237 = vmatpush.msrb.mxu1 %v154_v0 }
  0x2a   :  { %258 = vmatpush.msrb.mxu2 %v169_v61  ;;  %218 = vmatpush.msrb.mxu0 %v137_v63 }
  0x2b   :  { %278 = vmatpush.msrb.mxu3 %v185_v2  ;;  %238 = vmatpush.msrb.mxu1 %v153_v4 }
  0x2c   :  { %259 = vmatpush.msrb.mxu2 %v168_v1  ;;  %219 = vmatpush.msrb.mxu0 %v136_v3 }
  0x2d   :  { %279 = vmatpush.msrb.mxu3 %v184_v5  ;;  %239 = vmatpush.msrb.mxu1 %v152_v6 }
  0x8a   :  { %v73_v10 = vpop.f32.mrf.mxu0  ;;  %v93_v11 = vpop.f32.mrf.mxu1 }
  0x8b   :  { %v74_v13 = vadd.f32 %v73_v10, %v26_v8  ;;  %v94_v15 = vadd.f32 %v93_v11, %v27_v9 }
  0x8d   :  { %220 = vmatmul.f32.vlgmr.msrb.gmra.mxu0 %v74_v13  ;;  %240 = vmatmul.f32.vlgmr.msrb.gmra.mxu1 %v94_v15 }
  0x8e   :  { %v113_v16 = vpop.f32.mrf.mxu2  ;;  %v133_v17 = vpop.f32.mrf.mxu3 }
  0x8f   :  { %v114_v18 = vadd.f32 %v113_v16, %v28_v12  ;;  %v134_v19 = vadd.f32 %v133_v17, %v29_v14 }
  0x91   :  { %260 = vmatmul.f32.vlgmr.msrb.gmra.mxu2 %v114_v18  ;;  %280 = vmatmul.f32.vlgmr.msrb.gmra.mxu3 %v134_v19 }
 0x10a   :  { %v221_v21 = vpop.f32.mrf.mxu0  ;;  %v241_v23 = vpop.f32.mrf.mxu1 }
 0x10b   :  { %v222_v22 = vadd.f32 %v311_v20, %v221_v21 }
 0x10d   :  { %v242_v24 = vadd.f32 %v241_v23, %v222_v22 }
 0x114   :  { %v261_v25 = vpop.f32.mrf.mxu2  ;;  %v281_v26 = vpop.f32.mrf.mxu3 }
 0x115   :  { %v262_v27 = vadd.f32 %v261_v25, %v242_v24 }
 0x117   :  { %v282_v28 = vadd.f32 %v281_v26, %v262_v27 }
 0x119   :  { %285 = vst.msk [vmem:[#allocation2] sm:$0x3f] %vm284_vm2, %v282_v28 }
 0x11a   :  { %296 = dma.vmem_to_hbm [thread:$0]  %s292_s20, 128, %s294_s23, [#allocation3]  }
 0x11b   :  { %336 = dma.done.wait [#allocation3], 128  }
 0x11c   :  { %337 = vsyncadd [#allocation3], 4294967168 }
 0x11d   :  { %301 = vsyncpa [#allocation3], 1 }

</bundles_post_ra>
